<compile_context>
chip_gen: v5e
topology: v5e:2x2
jax: 0.10.0
libtpu: 0.0.40
codegen_flags: <defaults>
</compile_context>

<pallas_src>
import math

import jax
import jax.numpy as jnp
import numpy as np
from jax.experimental import pallas as pl
from jax.experimental.pallas import tpu as pltpu

_GELU_K = math.sqrt(2.0 / math.pi)


def _gelu_tanh(x):
    # GELU with tanh approximation (matches nn.GELU(approximate='tanh')).
    return 0.5 * x * (1.0 + jnp.tanh(_GELU_K * (x + 0.044715 * (x * x * x))))


def _fc1_gelu_into(x, w1_ref, b1_ref, h_ref):
    h = jnp.dot(x, w1_ref[...], preferred_element_type=jnp.float32)
    h = h + b1_ref[...].astype(jnp.float32)
    h_ref[...] = _gelu_tanh(h).astype(h_ref.dtype)


def _fc2(h_ref, w2_ref, b2_ref, out_dtype):
    out = jnp.dot(h_ref[...], w2_ref[...], preferred_element_type=jnp.float32)
    out = out + b2_ref[...].astype(jnp.float32)
    return out.astype(out_dtype)


def _mlp_kernel(x_ref, w1_ref, b1_ref, w2_ref, b2_ref, o_ref, h_ref):
    # fc1+GELU once per row tile (j == 0); fc2 per output-column tile.
    @pl.when(pl.program_id(1) == 0)
    def _():
        _fc1_gelu_into(x_ref[...], w1_ref, b1_ref, h_ref)

    o_ref[...] = _fc2(h_ref, w2_ref, b2_ref, o_ref.dtype)


def _mlp_drop_kernel(drop_ref, x_ref, y_ref, w1_ref, b1_ref, w2_ref, b2_ref,
                     o_ref, h_ref):
    # Fused classifier-free-guidance token drop: the whole (b, n) row group
    # uses the learned null y_embedding when its drop flag (SMEM prefetch) is 1.
    g = pl.program_id(0)

    @pl.when(pl.program_id(1) == 0)
    def _():
        x = x_ref[0]                                    # (T_pad, C)
        sel = jnp.broadcast_to(drop_ref[g], x.shape) == 1
        x = jnp.where(sel, y_ref[...], x)
        _fc1_gelu_into(x, w1_ref, b1_ref, h_ref)

    o_ref[0] = _fc2(h_ref, w2_ref, b2_ref, o_ref.dtype)


def _spec(shape, index_map, mode=None):
    if mode is None:
        return pl.BlockSpec(shape, index_map)
    return pl.BlockSpec(shape, index_map, pipeline_mode=mode)


def _sublane(dtype):
    return max(8, 32 // jnp.dtype(dtype).itemsize)     # 8 f32 / 16 bf16 / 32 i8


def _round_up(x, m):
    return -(-x // m) * m


def _vmem_capacity_bytes():
    try:
        return int(pltpu.get_tpu_info().vmem_capacity_bytes)
    except Exception:
        return 64 << 20          # conservative: v7x per-TensorCore VMEM


def _pick_tn(hidden, itemsize, vmem_cap):
    # Keep W2 fully resident (one HBM pass, no per-row-tile re-stream) unless
    # it is large for this chip's VMEM; threshold is tighter on 64 MiB parts.
    thresh = (4 << 20) if vmem_cap <= (64 << 20) else (8 << 20)
    if hidden * hidden * itemsize <= thresh:
        return hidden
    for cand in (1024, 768, 512, 384, 256, 128):
        if hidden % cand == 0:
            return cand
    return hidden  # TODO(synk): huge non-128-multiple hidden stays untiled.


def caption_embedder_forward(caption, params, *, train=False, force_drop_ids=None,
                             uncond_prob=0.0, rng=None):
    """caption: (B, ..., T, C).  Returns (B, ..., T, H) in the params' dtype."""
    w1, b1, w2, b2 = params["w1"], params["b1"], params["w2"], params["b2"]
    y_emb = params["y_embedding"]
    dtype = w1.dtype
    isz = jnp.dtype(dtype).itemsize

    lead = caption.shape[:-2]                # (B, N, ...)
    B = caption.shape[0]
    T, C = caption.shape[-2], caption.shape[-1]
    H = w2.shape[1]
    assert w1.shape == (C, H) and w2.shape == (H, H)

    use_drop = (train and uncond_prob > 0) or (force_drop_ids is not None)
    if train or use_drop:
        assert caption.shape[-2:] == y_emb.shape

    vmem_cap = _vmem_capacity_bytes()
    sub = _sublane(dtype)
    tn = _pick_tn(H, isz, vmem_cap)
    grid_j = H // tn

    G = int(np.prod(lead, dtype=np.int64))   # number of (b, n, ...) row groups
    M = G * T

    if use_drop:
        if force_drop_ids is None:
            if rng is None:
                raise ValueError("rng key required for stochastic token drop")
            drop = jax.random.uniform(rng, (B,)) < uncond_prob
        else:
            drop = force_drop_ids == 1
        # Per-group flags in SMEM via scalar prefetch; y_embedding stays one
        # resident (T_pad, C) block — no (M, C) y_rows stream through HBM.
        group_drop = jnp.repeat(drop.astype(jnp.int32), G // B)

        t_pad = _round_up(T, sub)
        x3d = caption.reshape(G, T, C).astype(dtype)
        y2d = y_emb.astype(dtype)
        if t_pad != T:
            x3d = jnp.pad(x3d, ((0, 0), (0, t_pad - T), (0, 0)))
            y2d = jnp.pad(y2d, ((0, t_pad - T), (0, 0)))
        tm = t_pad
        grid = (G, grid_j)
        kernel = _mlp_drop_kernel
        num_prefetch = 1
        prefetch_args = (group_drop,)
        data_args = (x3d, y2d, w1, b1, w2, b2)
        out_shape = jax.ShapeDtypeStruct((G, t_pad, H), dtype)

        def build_specs(use_pm):
            res = pl.Buffered(1) if use_pm else None
            w2m = pl.Buffered(3) if (use_pm and grid_j > 2) else None
            in_specs = [
                _spec((1, tm, C), lambda g, j, d: (g, 0, 0)),          # caption
                _spec((tm, C), lambda g, j, d: (0, 0), res),           # y_emb
                _spec((C, H), lambda g, j, d: (0, 0), res),            # W1
                _spec((1, H), lambda g, j, d: (0, 0), res),            # b1
                _spec((H, tn), lambda g, j, d: (0, j), w2m),           # W2 tile
                _spec((1, tn), lambda g, j, d: (0, j), w2m),           # b2 tile
            ]
            out_specs = _spec((1, tm, tn), lambda g, j, d: (g, 0, j))
            return in_specs, out_specs
    else:
        m_pad = _round_up(M, sub)
        if m_pad > 256:
            tm = 256
            m_pad = _round_up(m_pad, tm)
        else:
            tm = m_pad
        x2d = caption.reshape(M, C).astype(dtype)
        if m_pad != M:
            x2d = jnp.pad(x2d, ((0, m_pad - M), (0, 0)))
        grid = (m_pad // tm, grid_j)
        kernel = _mlp_kernel
        num_prefetch = 0
        prefetch_args = ()
        data_args = (x2d, w1, b1, w2, b2)
        out_shape = jax.ShapeDtypeStruct((m_pad, H), dtype)

        def build_specs(use_pm):
            res = pl.Buffered(1) if use_pm else None
            w2m = pl.Buffered(3) if (use_pm and grid_j > 2) else None
            in_specs = [
                _spec((tm, C), lambda i, j: (i, 0)),                   # caption
                _spec((C, H), lambda i, j: (0, 0), res),               # W1
                _spec((1, H), lambda i, j: (0, 0), res),               # b1
                _spec((H, tn), lambda i, j: (0, j), w2m),              # W2 tile
                _spec((1, tn), lambda i, j: (0, j), w2m),              # b2 tile
            ]
            out_specs = _spec((tm, tn), lambda i, j: (i, j))
            return in_specs, out_specs

    # Advisory cost estimate so XLA schedules neighbors around this small call.
    rows = grid[0] * tm
    flops = 2 * rows * C * H + 2 * rows * H * H
    transcendentals = rows * H
    bytes_accessed = isz * (rows * C + C * H + H + H * H + H + rows * H)
    if use_drop:
        bytes_accessed += 4 * G + isz * tm * C
    cost = pl.CostEstimate(flops=int(flops), transcendentals=int(transcendentals),
                           bytes_accessed=int(bytes_accessed))

    def run(use_pm):
        in_specs, out_specs = build_specs(use_pm)
        # Scoped-VMEM budget: resident W1/b1 (+ y_emb in drop mode), streamed
        # x / W2 / b2 / out tiles, the h scratch, f32 temporaries, slack —
        # clamped to the actual hardware VMEM minus headroom (v7x = 64 MiB).
        res_bufs = 1 if use_pm else 2
        vmem = res_bufs * isz * (C * H + H)
        if use_drop:
            vmem += res_bufs * isz * tm * C
        vmem += 2 * isz * tm * C
        w2_bufs = 3 if (use_pm and grid_j > 2) else 2
        vmem += w2_bufs * isz * (H * tn + tn)
        vmem += 2 * isz * tm * tn
        vmem += isz * tm * H                       # h scratch (param dtype)
        vmem += 4 * tm * max(H, tn)                # f32 temporaries
        vmem += 4 << 20                            # slack
        vmem = int(min(vmem, vmem_cap - (8 << 20)))

        grid_spec = pltpu.PrefetchScalarGridSpec(
            num_scalar_prefetch=num_prefetch, grid=grid,
            in_specs=in_specs, out_specs=out_specs,
            scratch_shapes=[pltpu.VMEM((tm, H), dtype)])
        return pl.pallas_call(
            kernel, out_shape=out_shape, grid_spec=grid_spec,
            cost_estimate=cost,
            compiler_params=pltpu.CompilerParams(
                dimension_semantics=("parallel", "arbitrary"),
                vmem_limit_bytes=vmem),
        )(*prefetch_args, *data_args)

    try:
        out = run(True)
    except Exception:
        # pl.Buffered pipeline_mode not supported by this jax version; fall
        # back to default double-buffering (identical results, more VMEM).
        out = run(False)

    if use_drop:
        return out[:, :T, :].reshape(lead + (T, H))
    return out[:M].reshape(lead + (T, H))


def init_params(key, in_channels, hidden_size, token_num=120, dtype=jnp.bfloat16):
    """Weights stored as (in, out) and already cast to the compute dtype.

    bf16 by default: this operator is weight-stream-bound, so halving the
    W1/W2 HBM bytes (and VMEM blocks) is the dominant lever on all chips.
    """
    ky, k1, k2, k3, k4 = jax.random.split(key, 5)
    s1 = 1.0 / math.sqrt(in_channels)
    s2 = 1.0 / math.sqrt(hidden_size)
    return {
        "w1": jax.random.uniform(k1, (in_channels, hidden_size), jnp.float32,
                                 -s1, s1).astype(dtype),
        "b1": jax.random.uniform(k2, (1, hidden_size), jnp.float32,
                                 -s1, s1).astype(dtype),
        "w2": jax.random.uniform(k3, (hidden_size, hidden_size), jnp.float32,
                                 -s2, s2).astype(dtype),
        "b2": jax.random.uniform(k4, (1, hidden_size), jnp.float32,
                                 -s2, s2).astype(dtype),
        "y_embedding": (jax.random.normal(ky, (token_num, in_channels), jnp.float32)
                        / math.sqrt(in_channels)).astype(dtype),
    }


def _reference(caption, params, *, train=False, force_drop_ids=None,
               uncond_prob=0.0, rng=None):
    dtype = params["w1"].dtype
    x = caption
    if (train and uncond_prob > 0) or (force_drop_ids is not None):
        if force_drop_ids is None:
            drop = jax.random.uniform(rng, (caption.shape[0],)) < uncond_prob
        else:
            drop = force_drop_ids == 1
        x = jnp.where(drop[:, None, None, None], params["y_embedding"], x)
    x = x.astype(dtype)
    h = jnp.dot(x, params["w1"], preferred_element_type=jnp.float32) + params["b1"]
    h = 0.5 * h * (1.0 + jnp.tanh(_GELU_K * (h + 0.044715 * h ** 3)))
    h = h.astype(dtype)
    out = jnp.dot(h, params["w2"], preferred_element_type=jnp.float32) + params["b2"]
    return out.astype(dtype)


if __name__ == "__main__":
    key = jax.random.PRNGKey(0)
    k_cap, k_params = jax.random.split(key)

    batch, token_num, in_channels, hidden = 2, 8, 16, 32
    uncond_prob = 0.1

    caption = jax.random.normal(k_cap, (batch, 1, token_num, in_channels),
                                jnp.float32)
    force = jnp.array([1, 0], jnp.int32)

    # --- f32 params: strict numerical check of both paths. ---
    params32 = init_params(k_params, in_channels, hidden, token_num=token_num,
                           dtype=jnp.float32)

    out_infer = jax.block_until_ready(
        caption_embedder_forward(caption, params32, train=False,
                                 uncond_prob=uncond_prob))
    ref_infer = _reference(caption, params32, train=False, uncond_prob=uncond_prob)
    np.testing.assert_allclose(np.asarray(out_infer), np.asarray(ref_infer),
                               rtol=1e-5, atol=1e-5)

    out_drop = jax.block_until_ready(
        caption_embedder_forward(caption, params32, train=True,
                                 uncond_prob=uncond_prob, force_drop_ids=force))
    ref_drop = _reference(caption, params32, train=True, uncond_prob=uncond_prob,
                          force_drop_ids=force)
    np.testing.assert_allclose(np.asarray(out_drop), np.asarray(ref_drop),
                               rtol=1e-5, atol=1e-5)

    # --- bf16 params (production dtype per perf feedback), loose tolerance. ---
    params16 = init_params(k_params, in_channels, hidden, token_num=token_num)
    out_bf = jax.block_until_ready(
        caption_embedder_forward(caption, params16, train=True,
                                 uncond_prob=uncond_prob, force_drop_ids=force))
    ref_bf = _reference(caption, params16, train=True, uncond_prob=uncond_prob,
                        force_drop_ids=force)
    np.testing.assert_allclose(np.asarray(out_bf.astype(jnp.float32)),
                               np.asarray(ref_bf.astype(jnp.float32)),
                               rtol=5e-2, atol=5e-2)

    print("KERNEL_OK")
</pallas_src>

<mosaic_0001>
module attributes {stable_mosaic.version = 11 : i64} {
  func.func @_mlp_kernel(%arg0: i32, %arg1: i32, %arg2: memref<16x16xf32, #tpu.memory_space<vmem>>, %arg3: memref<16x32xf32, #tpu.memory_space<vmem>>, %arg4: memref<1x32xf32, #tpu.memory_space<vmem>>, %arg5: memref<32x32xf32, #tpu.memory_space<vmem>>, %arg6: memref<1x32xf32, #tpu.memory_space<vmem>>, %arg7: memref<16x32xf32, #tpu.memory_space<vmem>>, %arg8: memref<16x32xf32, #tpu.memory_space<vmem>>) attributes {dimension_semantics = [#tpu.dimension_semantics<parallel>, #tpu.dimension_semantics<arbitrary>], iteration_bounds = array<i64: 1, 1>, scalar_prefetch = 0 : i64, scratch_operands = 1 : i64, tpu.core_type = #tpu.core_type<tc>, window_params = [{transform_indices = @transform_0, window_bounds = array<i64: 16, 16>}, {pipeline_mode = #tpu.pipeline_mode<synchronous>, transform_indices = @transform_1, window_bounds = array<i64: 16, 32>}, {pipeline_mode = #tpu.pipeline_mode<synchronous>, transform_indices = @transform_2, window_bounds = array<i64: 1, 32>}, {transform_indices = @transform_3, window_bounds = array<i64: 32, 32>}, {transform_indices = @transform_4, window_bounds = array<i64: 1, 32>}, {transform_indices = @transform_5, window_bounds = array<i64: 16, 32>}]} {
    %c0_i32 = arith.constant 0 : i32
    %0 = arith.cmpi eq, %arg1, %c0_i32 : i32
    %1 = arith.extui %0 : i1 to i32
    %c0_i32_0 = arith.constant 0 : i32
    %2 = arith.cmpi ne, %1, %c0_i32_0 : i32
    scf.if %2 {
      %c0_8 = arith.constant 0 : index
      %c0_9 = arith.constant 0 : index
      %10 = vector.load %arg2[%c0_8, %c0_9] : memref<16x16xf32, #tpu.memory_space<vmem>>, vector<16x16xf32>
      %c0_10 = arith.constant 0 : index
      %c0_11 = arith.constant 0 : index
      %11 = vector.load %arg3[%c0_10, %c0_11] : memref<16x32xf32, #tpu.memory_space<vmem>>, vector<16x32xf32>
      %cst_12 = arith.constant dense<0.000000e+00> : vector<16x32xf32>
      %12 = tpu.matmul %10, %11, %cst_12 {dimension_numbers = #tpu.dot_dimension_numbers<[1], [0], [0], [1], [0, 0, 1, 1], [], []>} : vector<16x16xf32>, vector<16x32xf32>, vector<16x32xf32> -> vector<16x32xf32>
      %c0_13 = arith.constant 0 : index
      %c0_14 = arith.constant 0 : index
      %13 = vector.load %arg4[%c0_13, %c0_14] : memref<1x32xf32, #tpu.memory_space<vmem>>, vector<1x32xf32>
      %14 = vector.broadcast %13 : vector<1x32xf32> to vector<16x32xf32>
      %15 = arith.addf %12, %14 : vector<16x32xf32>
      %cst_15 = arith.constant 5.000000e-01 : f32
      %16 = vector.broadcast %cst_15 : f32 to vector<16x32xf32>
      %17 = arith.mulf %16, %15 : vector<16x32xf32>
      %18 = arith.mulf %15, %15 : vector<16x32xf32>
      %19 = arith.mulf %18, %15 : vector<16x32xf32>
      %cst_16 = arith.constant 4.471500e-02 : f32
      %20 = vector.broadcast %cst_16 : f32 to vector<16x32xf32>
      %21 = arith.mulf %20, %19 : vector<16x32xf32>
      %22 = arith.addf %15, %21 : vector<16x32xf32>
      %cst_17 = arith.constant 0.797884583 : f32
      %23 = vector.broadcast %cst_17 : f32 to vector<16x32xf32>
      %24 = arith.mulf %23, %22 : vector<16x32xf32>
      %25 = math.tanh %24 : vector<16x32xf32>
      %cst_18 = arith.constant 1.000000e+00 : f32
      %26 = vector.broadcast %cst_18 : f32 to vector<16x32xf32>
      %27 = arith.addf %26, %25 : vector<16x32xf32>
      %28 = arith.mulf %17, %27 : vector<16x32xf32>
      %c0_19 = arith.constant 0 : index
      %c0_20 = arith.constant 0 : index
      %29 = vector.load %arg8[%c0_19, %c0_20] : memref<16x32xf32, #tpu.memory_space<vmem>>, vector<16x32xf32>
      tpu.vector_store %arg8[%c0_19, %c0_20], %28 {strides = array<i32>} : memref<16x32xf32, #tpu.memory_space<vmem>>, vector<16x32xf32>,
    } else {
    }
    %c0 = arith.constant 0 : index
    %c0_1 = arith.constant 0 : index
    %3 = vector.load %arg8[%c0, %c0_1] : memref<16x32xf32, #tpu.memory_space<vmem>>, vector<16x32xf32>
    %c0_2 = arith.constant 0 : index
    %c0_3 = arith.constant 0 : index
    %4 = vector.load %arg5[%c0_2, %c0_3] : memref<32x32xf32, #tpu.memory_space<vmem>>, vector<32x32xf32>
    %cst = arith.constant dense<0.000000e+00> : vector<16x32xf32>
    %5 = tpu.matmul %3, %4, %cst {dimension_numbers = #tpu.dot_dimension_numbers<[1], [0], [0], [1], [0, 0, 1, 1], [], []>} : vector<16x32xf32>, vector<32x32xf32>, vector<16x32xf32> -> vector<16x32xf32>
    %c0_4 = arith.constant 0 : index
    %c0_5 = arith.constant 0 : index
    %6 = vector.load %arg6[%c0_4, %c0_5] : memref<1x32xf32, #tpu.memory_space<vmem>>, vector<1x32xf32>
    %7 = vector.broadcast %6 : vector<1x32xf32> to vector<16x32xf32>
    %8 = arith.addf %5, %7 : vector<16x32xf32>
    %c0_6 = arith.constant 0 : index
    %c0_7 = arith.constant 0 : index
    %9 = vector.load %arg7[%c0_6, %c0_7] : memref<16x32xf32, #tpu.memory_space<vmem>>, vector<16x32xf32>
    tpu.vector_store %arg7[%c0_6, %c0_7], %8 {strides = array<i32>} : memref<16x32xf32, #tpu.memory_space<vmem>>, vector<16x32xf32>,
    return
  }
  func.func @transform_0(%arg0: i32, %arg1: i32) -> (i32, i32) {
    %c0_i32 = arith.constant 0 : i32
    %c0_i32_0 = arith.constant 0 : i32
    return %arg0, %c0_i32 : i32, i32
  }
  func.func @transform_1(%arg0: i32, %arg1: i32) -> (i32, i32) {
    %c0_i32 = arith.constant 0 : i32
    %c0_i32_0 = arith.constant 0 : i32
    %c0_i32_1 = arith.constant 0 : i32
    return %c0_i32, %c0_i32_0 : i32, i32
  }
  func.func @transform_2(%arg0: i32, %arg1: i32) -> (i32, i32) {
    %c0_i32 = arith.constant 0 : i32
    %c0_i32_0 = arith.constant 0 : i32
    %c0_i32_1 = arith.constant 0 : i32
    return %c0_i32, %c0_i32_0 : i32, i32
  }
  func.func @transform_3(%arg0: i32, %arg1: i32) -> (i32, i32) {
    %c0_i32 = arith.constant 0 : i32
    %c0_i32_0 = arith.constant 0 : i32
    return %c0_i32, %arg1 : i32, i32
  }
  func.func @transform_4(%arg0: i32, %arg1: i32) -> (i32, i32) {
    %c0_i32 = arith.constant 0 : i32
    %c0_i32_0 = arith.constant 0 : i32
    return %c0_i32, %arg1 : i32, i32
  }
  func.func @transform_5(%arg0: i32, %arg1: i32) -> (i32, i32) {
    %c0_i32 = arith.constant 0 : i32
    return %arg0, %arg1 : i32, i32
  }
}

module attributes {stable_mosaic.version = 11 : i64} {
  func.func @_mlp_kernel(%arg0: i32, %arg1: i32, %arg2: memref<16x16xf32, #tpu.memory_space<vmem>>, %arg3: memref<16x32xf32, #tpu.memory_space<vmem>>, %arg4: memref<1x32xf32, #tpu.memory_space<vmem>>, %arg5: memref<32x32xf32, #tpu.memory_space<vmem>>, %arg6: memref<1x32xf32, #tpu.memory_space<vmem>>, %arg7: memref<16x32xf32, #tpu.memory_space<vmem>>, %arg8: memref<16x32xf32, #tpu.memory_space<vmem>>) attributes {dimension_semantics = [#tpu.dimension_semantics<parallel>, #tpu.dimension_semantics<arbitrary>], iteration_bounds = array<i64: 1, 1>, scalar_prefetch = 0 : i64, scratch_operands = 1 : i64, tpu.core_type = #tpu.core_type<tc>, window_params = [{transform_indices = @transform_0, window_bounds = array<i64: 16, 16>}, {pipeline_mode = #tpu.pipeline_mode<synchronous>, transform_indices = @transform_1, window_bounds = array<i64: 16, 32>}, {pipeline_mode = #tpu.pipeline_mode<synchronous>, transform_indices = @transform_2, window_bounds = array<i64: 1, 32>}, {transform_indices = @transform_3, window_bounds = array<i64: 32, 32>}, {transform_indices = @transform_4, window_bounds = array<i64: 1, 32>}, {transform_indices = @transform_5, window_bounds = array<i64: 16, 32>}]} {
    %c0_i32 = arith.constant 0 : i32
    %0 = arith.cmpi eq, %arg1, %c0_i32 : i32
    %1 = arith.extui %0 : i1 to i32
    %c0_i32_0 = arith.constant 0 : i32
    %2 = arith.cmpi ne, %1, %c0_i32_0 : i32
    scf.if %2 {
      %c0_8 = arith.constant 0 : index
      %c0_9 = arith.constant 0 : index
      %10 = vector.load %arg2[%c0_8, %c0_9] : memref<16x16xf32, #tpu.memory_space<vmem>>, vector<16x16xf32>
      %c0_10 = arith.constant 0 : index
      %c0_11 = arith.constant 0 : index
      %11 = vector.load %arg3[%c0_10, %c0_11] : memref<16x32xf32, #tpu.memory_space<vmem>>, vector<16x32xf32>
      %cst_12 = arith.constant dense<0.000000e+00> : vector<16x32xf32>
      %12 = tpu.matmul %10, %11, %cst_12 {dimension_numbers = #tpu.dot_dimension_numbers<[1], [0], [0], [1], [0, 0, 1, 1], [], []>} : vector<16x16xf32>, vector<16x32xf32>, vector<16x32xf32> -> vector<16x32xf32>
      %c0_13 = arith.constant 0 : index
      %c0_14 = arith.constant 0 : index
      %13 = vector.load %arg4[%c0_13, %c0_14] : memref<1x32xf32, #tpu.memory_space<vmem>>, vector<1x32xf32>
      %14 = vector.broadcast %13 : vector<1x32xf32> to vector<16x32xf32>
      %15 = arith.addf %12, %14 : vector<16x32xf32>
      %cst_15 = arith.constant 5.000000e-01 : f32
      %16 = vector.broadcast %cst_15 : f32 to vector<16x32xf32>
      %17 = arith.mulf %16, %15 : vector<16x32xf32>
      %18 = arith.mulf %15, %15 : vector<16x32xf32>
      %19 = arith.mulf %18, %15 : vector<16x32xf32>
      %cst_16 = arith.constant 4.471500e-02 : f32
      %20 = vector.broadcast %cst_16 : f32 to vector<16x32xf32>
      %21 = arith.mulf %20, %19 : vector<16x32xf32>
      %22 = arith.addf %15, %21 : vector<16x32xf32>
      %cst_17 = arith.constant 0.797884583 : f32
      %23 = vector.broadcast %cst_17 : f32 to vector<16x32xf32>
      %24 = arith.mulf %23, %22 : vector<16x32xf32>
      %25 = math.tanh %24 : vector<16x32xf32>
      %cst_18 = arith.constant 1.000000e+00 : f32
      %26 = vector.broadcast %cst_18 : f32 to vector<16x32xf32>
      %27 = arith.addf %26, %25 : vector<16x32xf32>
      %28 = arith.mulf %17, %27 : vector<16x32xf32>
      %c0_19 = arith.constant 0 : index
      %c0_20 = arith.constant 0 : index
      %29 = vector.load %arg8[%c0_19, %c0_20] : memref<16x32xf32, #tpu.memory_space<vmem>>, vector<16x32xf32>
      tpu.vector_store %arg8[%c0_19, %c0_20], %28 {strides = array<i32>} : memref<16x32xf32, #tpu.memory_space<vmem>>, vector<16x32xf32>,
    } else {
    }
    %c0 = arith.constant 0 : index
    %c0_1 = arith.constant 0 : index
    %3 = vector.load %arg8[%c0, %c0_1] : memref<16x32xf32, #tpu.memory_space<vmem>>, vector<16x32xf32>
    %c0_2 = arith.constant 0 : index
    %c0_3 = arith.constant 0 : index
    %4 = vector.load %arg5[%c0_2, %c0_3] : memref<32x32xf32, #tpu.memory_space<vmem>>, vector<32x32xf32>
    %cst = arith.constant dense<0.000000e+00> : vector<16x32xf32>
    %5 = tpu.matmul %3, %4, %cst {dimension_numbers = #tpu.dot_dimension_numbers<[1], [0], [0], [1], [0, 0, 1, 1], [], []>} : vector<16x32xf32>, vector<32x32xf32>, vector<16x32xf32> -> vector<16x32xf32>
    %c0_4 = arith.constant 0 : index
    %c0_5 = arith.constant 0 : index
    %6 = vector.load %arg6[%c0_4, %c0_5] : memref<1x32xf32, #tpu.memory_space<vmem>>, vector<1x32xf32>
    %7 = vector.broadcast %6 : vector<1x32xf32> to vector<16x32xf32>
    %8 = arith.addf %5, %7 : vector<16x32xf32>
    %c0_6 = arith.constant 0 : index
    %c0_7 = arith.constant 0 : index
    %9 = vector.load %arg7[%c0_6, %c0_7] : memref<16x32xf32, #tpu.memory_space<vmem>>, vector<16x32xf32>
    tpu.vector_store %arg7[%c0_6, %c0_7], %8 {strides = array<i32>} : memref<16x32xf32, #tpu.memory_space<vmem>>, vector<16x32xf32>,
    return
  }
  func.func @transform_0(%arg0: i32, %arg1: i32) -> (i32, i32) {
    %c0_i32 = arith.constant 0 : i32
    %c0_i32_0 = arith.constant 0 : i32
    return %arg0, %c0_i32 : i32, i32
  }
  func.func @transform_1(%arg0: i32, %arg1: i32) -> (i32, i32) {
    %c0_i32 = arith.constant 0 : i32
    %c0_i32_0 = arith.constant 0 : i32
    %c0_i32_1 = arith.constant 0 : i32
    return %c0_i32, %c0_i32_0 : i32, i32
  }
  func.func @transform_2(%arg0: i32, %arg1: i32) -> (i32, i32) {
    %c0_i32 = arith.constant 0 : i32
    %c0_i32_0 = arith.constant 0 : i32
    %c0_i32_1 = arith.constant 0 : i32
    return %c0_i32, %c0_i32_0 : i32, i32
  }
  func.func @transform_3(%arg0: i32, %arg1: i32) -> (i32, i32) {
    %c0_i32 = arith.constant 0 : i32
    %c0_i32_0 = arith.constant 0 : i32
    return %c0_i32, %arg1 : i32, i32
  }
  func.func @transform_4(%arg0: i32, %arg1: i32) -> (i32, i32) {
    %c0_i32 = arith.constant 0 : i32
    %c0_i32_0 = arith.constant 0 : i32
    return %c0_i32, %arg1 : i32, i32
  }
  func.func @transform_5(%arg0: i32, %arg1: i32) -> (i32, i32) {
    %c0_i32 = arith.constant 0 : i32
    return %arg0, %arg1 : i32, i32
  }
}

</mosaic_0001>

<bundles_post_ra>
// kernel: tpu_custom_call.1
= control target key start
LH: loop header
LB: loop body
LE: loop exit
PB: predicated region body
PF: predicated region fallthrough
CT: control target
= control target key end

     0   :  { %10 = vsyncpa [#allocation4], 0  ;;  %s389_s0 = inlined_call_operand.hbm [shape: f32[16,16], index: 0, kind: input, shape index: {}]   ;;  %s390_s1 = inlined_call_operand.hbm [shape: f32[16,32], index: 1, kind: input, shape index: {}]   ;;  %s391_s2 = inlined_call_operand.vmem [shape: f32[1,32], index: 2, kind: input, shape index: {}]   ;;  %s392_s3 = inlined_call_operand.hbm [shape: f32[32,32], index: 3, kind: input, shape index: {}]   ;;  %s393_s4 = inlined_call_operand.vmem [shape: f32[1,32], index: 4, kind: input, shape index: {}]   ;;  %s394_s5 = inlined_call_operand.hbm [shape: f32[16,32], index: 5, kind: output, shape index: {}]  }
   0x1   :  { %11 = vsyncpa [#allocation7], 0 }
   0x2   :  { %12 = vsyncpa [#allocation5], 0  ;;  %s30_s20 = sshll.u32 %s390_s1, 4  ;;  %s317_s21 = smov [#allocation6]   ;;  %s31_s20 = int_to_ptr.hbm [resolvable:$true] %s30_s20 }
   0x3   :  { %s32_s22 = sshll.u32 %s317_s21, 4  ;;  %s17_s25 = sshll.u32 %s389_s0, 4  ;;  %s33_s22 = int_to_ptr.vmem [resolvable:$true] %s32_s22  ;;  %s18_s25 = int_to_ptr.hbm [resolvable:$true] %s17_s25 }
   0x4   :  { %s318_s26 = smov 128   ;;  %s319_s27 = smov 8  }
   0x5   :  { %38 = dma.hbm_to_vmem [thread:$0]  %s31_s20, 256, %s33_s22, [#allocation7], %s318_s26, %s318_s26, %s319_s27  }
   0x6   :  { %s320_s28 = smov [#allocation3]   ;;  %s45_s1 = sshll.u32 %s392_s3, 4  ;;  %s46_s1 = int_to_ptr.hbm [resolvable:$true] %s45_s1 }
   0x7   :  { %s19_s29 = sshll.u32 %s320_s28, 4  ;;  %s321_s0 = smov [#allocation8]   ;;  %s20_s29 = int_to_ptr.vmem [resolvable:$true] %s19_s29 }
   0x8   :  { %25 = dma.hbm_to_vmem [thread:$0]  %s18_s25, 256, %s20_s29, [#allocation4], %s318_s26, %s318_s26, %s319_s27  }
   0x9   :  { %s47_s7 = sshll.u32 %s321_s0, 4  ;;  %s48_s7 = int_to_ptr.vmem [resolvable:$true] %s47_s7 }
   0xa   :  { %53 = dma.hbm_to_vmem [thread:$0]  %s46_s1, 512, %s48_s7, [#allocation7], %s318_s26, %s318_s26, %s319_s27  }
   0xb   :  { %311 = dma.done.wait [#allocation4], 256  }
   0xc   :  { %312 = vsyncadd [#allocation4], 4294967040 }
   0xd   :  { %313 = dma.done.wait [#allocation7], 768  }
   0xe   :  { %314 = vsyncadd [#allocation7], 4294966528  ;;  %v75_v0 = vld [vmem:[#allocation6 + $0x8] sm:$0xff]  ;;  %v74_v1 = vld [vmem:[#allocation6] sm:$0xff]  ;;  %vm80_vm0 = vcmask 130048   ;;  %vm128_vm1 = vcmask 261120  }
   0xf   :  { %101 = vmatpush.msra.mxu0 %v75_v0  ;;  %197 = vmatpush.msra.mxu3 %v75_v0  ;;  %v72_v2 = vld [vmem:[#allocation3] sm:$0xff]  ;;  %v73_v3 = vld [vmem:[#allocation3 + $0x8] sm:$0xff]  ;;  %v136_v4 = vld [vmem:[#allocation8 + $0x18] sm:$0xff]  ;;  %s322_s10 = smov [#allocation9]   ;;  %s179_s14 = sshll.u32 %s394_s5, 4  ;;  %s180_s14 = int_to_ptr.hbm [resolvable:$true] %s179_s14 }
  0x10   :  { %160 = vmatpush.msra.mxu1 %v136_v4  ;;  %199 = vmatpush.msra.mxu2 %v136_v4  ;;  %v135_v5 = vld [vmem:[#allocation8 + $0x10] sm:$0xff]  ;;  %v134_v6 = vld [vmem:[#allocation8 + $0x8] sm:$0xff]  ;;  %v133_v7 = vld [vmem:[#allocation8] sm:$0xff]  ;;  %s177_s11 = sshll.u32 %s322_s10, 4  ;;  %s178_s11 = int_to_ptr.vmem [resolvable:$true] %s177_s11 }
  0x11   :  { %102 = vmatpush.msra.mxu0 %v74_v1  ;;  %198 = vmatpush.msra.mxu3 %v74_v1  ;;  %v209_v8 = vld [vmem:[%s391_s2] ss:$0 sm:$0xff] }
  0x12   :  { %193 = vmatmul.msk.f32.vlgmr.msra.gmra.mxu0 %vm80_vm0, %v72_v2  ;;  %194 = vmatmul.msk.f32.vlgmr.msra.gmra.mxu3 %vm80_vm0, %v73_v3  ;;  %v210_v33 = vld [vmem:[%s393_s4] ss:$0 sm:$0xff] }
  0x13   :  { %161 = vmatpush.msra.mxu1 %v135_v5  ;;  %200 = vmatpush.msra.mxu2 %v135_v5 }
  0x15   :  { %162 = vmatpush.msra.mxu1 %v134_v6  ;;  %201 = vmatpush.msra.mxu2 %v134_v6 }
  0x17   :  { %163 = vmatpush.msra.mxu1 %v133_v7  ;;  %202 = vmatpush.msra.mxu2 %v133_v7 }
  0x8f   :  { %v104_v9 = vpop.f32.mrf.mxu0 }
  0x90   :  { %v105_v10 = vadd.f32 %v209_v8, %v104_v9 }
  0x92   :  { %v112_v11 = vmul.f32 %v105_v10, %v105_v10  ;;  %v110_v24 = vmul.f32 0.5, %v105_v10 }
  0x94   :  { %v114_v12 = vmul.f32 %v112_v11, %v105_v10 }
  0x95   :  { %v107_v13 = vpop.f32.mrf.mxu3 }
  0x96   :  { %v116_v14 = vmul.f32 0.044715, %v114_v12  ;;  %v108_v15 = vadd.f32 %v209_v8, %v107_v13 }
  0x98   :  { %v118_v16 = vadd.f32 %v116_v14, %v105_v10  ;;  %v113_v17 = vmul.f32 %v108_v15, %v108_v15  ;;  %v111_v28 = vmul.f32 0.5, %v108_v15 }
  0x9a   :  { %v120_v18 = vmul.f32 0.7978846, %v118_v16  ;;  %v115_v19 = vmul.f32 %v113_v17, %v108_v15 }
  0x9c   :  { %211 = vtanh.f32 %v120_v18  ;;  %v117_v20 = vmul.f32 0.044715, %v115_v19 }
  0x9e   :  { %v119_v21 = vadd.f32 %v117_v20, %v108_v15 }
  0xa0   :  { %v121_v22 = vmul.f32 0.7978846, %v119_v21 }
  0xa2   :  { %v212_v23 = vpop.eup %211  ;;  %213 = vtanh.f32 %v121_v22 }
  0xa3   :  { %v124_v25 = vadd.f32 1.0, %v212_v23 }
  0xa5   :  { %v126_v26 = vmul.f32 %v124_v25, %v110_v24 }
  0xa7   :  { %129 = vst.msk [vmem:[#allocation2] sm:$0xff] %vm128_vm1, %v126_v26 }
  0xa8   :  { %v214_v27 = vpop.eup %213 }
  0xa9   :  { %v125_v29 = vadd.f32 1.0, %v214_v27 }
  0xab   :  { %v127_v30 = vmul.f32 %v125_v29, %v111_v28 }
  0xad   :  { %130 = vst.msk [vmem:[#allocation2 + $0x8] sm:$0xff] %vm128_vm1, %v127_v30 }
  0xae   :  { %v131_v31 = vld [vmem:[#allocation2] sm:$0xff] }
  0xaf   :  { %195 = vmatmul.msk.f32.vlgmr.msra.gmra.mxu1 %vm128_vm1, %v131_v31 }
  0xb4   :  { %v132_v32 = vld [vmem:[#allocation2 + $0x8] sm:$0xff] }
  0xb5   :  { %196 = vmatmul.msk.f32.vlgmr.msra.gmra.mxu2 %vm128_vm1, %v132_v32 }
 0x12c   :  { %v165_v34 = vpop.f32.mrf.mxu1 }
 0x12d   :  { %v166_v35 = vadd.f32 %v210_v33, %v165_v34 }
 0x12f   :  { %171 = vst.msk [vmem:[#allocation9] sm:$0xff] %vm128_vm1, %v166_v35 }
 0x138   :  { %v168_v36 = vpop.f32.mrf.mxu2 }
 0x139   :  { %v169_v37 = vadd.f32 %v210_v33, %v168_v36 }
 0x13b   :  { %172 = vst.msk [vmem:[#allocation9 + $0x8] sm:$0xff] %vm128_vm1, %v169_v37 }
 0x13c   :  { %185 = dma.vmem_to_hbm [thread:$0]  %s178_s11, 256, %s180_s14, [#allocation5], %s318_s26, %s318_s26, %s319_s27  }
 0x13d   :  { %315 = dma.done.wait [#allocation5], 256  }
 0x13e   :  { %316 = vsyncadd [#allocation5], 4294967040 }
 0x13f   :  { %190 = vsyncpa [#allocation4], 1 }
 0x140   :  { %191 = vsyncpa [#allocation7], 1 }
 0x141   :  { %192 = vsyncpa [#allocation5], 1 }

// kernel: tpu_custom_call.1
= control target key start
LH: loop header
LB: loop body
LE: loop exit
PB: predicated region body
PF: predicated region fallthrough
CT: control target
= control target key end

     0   :  { %10 = vsyncpa [#allocation4], 0  ;;  %s389_s0 = inlined_call_operand.hbm [shape: f32[16,16], index: 0, kind: input, shape index: {}]   ;;  %s390_s1 = inlined_call_operand.hbm [shape: f32[16,32], index: 1, kind: input, shape index: {}]   ;;  %s391_s2 = inlined_call_operand.vmem [shape: f32[1,32], index: 2, kind: input, shape index: {}]   ;;  %s392_s3 = inlined_call_operand.hbm [shape: f32[32,32], index: 3, kind: input, shape index: {}]   ;;  %s393_s4 = inlined_call_operand.vmem [shape: f32[1,32], index: 4, kind: input, shape index: {}]   ;;  %s394_s5 = inlined_call_operand.hbm [shape: f32[16,32], index: 5, kind: output, shape index: {}]  }
   0x1   :  { %11 = vsyncpa [#allocation7], 0 }
   0x2   :  { %12 = vsyncpa [#allocation5], 0  ;;  %s30_s20 = sshll.u32 %s390_s1, 4  ;;  %s317_s21 = smov [#allocation6]   ;;  %s31_s20 = int_to_ptr.hbm [resolvable:$true] %s30_s20 }
   0x3   :  { %s32_s22 = sshll.u32 %s317_s21, 4  ;;  %s17_s25 = sshll.u32 %s389_s0, 4  ;;  %s33_s22 = int_to_ptr.vmem [resolvable:$true] %s32_s22  ;;  %s18_s25 = int_to_ptr.hbm [resolvable:$true] %s17_s25 }
   0x4   :  { %s318_s26 = smov 128   ;;  %s319_s27 = smov 8  }
   0x5   :  { %38 = dma.hbm_to_vmem [thread:$0]  %s31_s20, 256, %s33_s22, [#allocation7], %s318_s26, %s318_s26, %s319_s27  }
   0x6   :  { %s320_s28 = smov [#allocation3]   ;;  %s45_s1 = sshll.u32 %s392_s3, 4  ;;  %s46_s1 = int_to_ptr.hbm [resolvable:$true] %s45_s1 }
   0x7   :  { %s19_s29 = sshll.u32 %s320_s28, 4  ;;  %s321_s0 = smov [#allocation8]   ;;  %s20_s29 = int_to_ptr.vmem [resolvable:$true] %s19_s29 }
   0x8   :  { %25 = dma.hbm_to_vmem [thread:$0]  %s18_s25, 256, %s20_s29, [#allocation4], %s318_s26, %s318_s26, %s319_s27  }
   0x9   :  { %s47_s7 = sshll.u32 %s321_s0, 4  ;;  %s48_s7 = int_to_ptr.vmem [resolvable:$true] %s47_s7 }
   0xa   :  { %53 = dma.hbm_to_vmem [thread:$0]  %s46_s1, 512, %s48_s7, [#allocation7], %s318_s26, %s318_s26, %s319_s27  }
   0xb   :  { %311 = dma.done.wait [#allocation4], 256  }
   0xc   :  { %312 = vsyncadd [#allocation4], 4294967040 }
   0xd   :  { %313 = dma.done.wait [#allocation7], 768  }
   0xe   :  { %314 = vsyncadd [#allocation7], 4294966528  ;;  %v75_v0 = vld [vmem:[#allocation6 + $0x8] sm:$0xff]  ;;  %v74_v1 = vld [vmem:[#allocation6] sm:$0xff]  ;;  %vm80_vm0 = vcmask 130048   ;;  %vm128_vm1 = vcmask 261120  }
   0xf   :  { %101 = vmatpush.msra.mxu0 %v75_v0  ;;  %197 = vmatpush.msra.mxu3 %v75_v0  ;;  %v72_v2 = vld [vmem:[#allocation3] sm:$0xff]  ;;  %v73_v3 = vld [vmem:[#allocation3 + $0x8] sm:$0xff]  ;;  %v136_v4 = vld [vmem:[#allocation8 + $0x18] sm:$0xff]  ;;  %s322_s10 = smov [#allocation9]   ;;  %s179_s14 = sshll.u32 %s394_s5, 4  ;;  %s180_s14 = int_to_ptr.hbm [resolvable:$true] %s179_s14 }
  0x10   :  { %160 = vmatpush.msra.mxu1 %v136_v4  ;;  %199 = vmatpush.msra.mxu2 %v136_v4  ;;  %v135_v5 = vld [vmem:[#allocation8 + $0x10] sm:$0xff]  ;;  %v134_v6 = vld [vmem:[#allocation8 + $0x8] sm:$0xff]  ;;  %v133_v7 = vld [vmem:[#allocation8] sm:$0xff]  ;;  %s177_s11 = sshll.u32 %s322_s10, 4  ;;  %s178_s11 = int_to_ptr.vmem [resolvable:$true] %s177_s11 }
  0x11   :  { %102 = vmatpush.msra.mxu0 %v74_v1  ;;  %198 = vmatpush.msra.mxu3 %v74_v1  ;;  %v209_v8 = vld [vmem:[%s391_s2] ss:$0 sm:$0xff] }
  0x12   :  { %193 = vmatmul.msk.f32.vlgmr.msra.gmra.mxu0 %vm80_vm0, %v72_v2  ;;  %194 = vmatmul.msk.f32.vlgmr.msra.gmra.mxu3 %vm80_vm0, %v73_v3  ;;  %v210_v33 = vld [vmem:[%s393_s4] ss:$0 sm:$0xff] }
  0x13   :  { %161 = vmatpush.msra.mxu1 %v135_v5  ;;  %200 = vmatpush.msra.mxu2 %v135_v5 }
  0x15   :  { %162 = vmatpush.msra.mxu1 %v134_v6  ;;  %201 = vmatpush.msra.mxu2 %v134_v6 }
  0x17   :  { %163 = vmatpush.msra.mxu1 %v133_v7  ;;  %202 = vmatpush.msra.mxu2 %v133_v7 }
  0x8f   :  { %v104_v9 = vpop.f32.mrf.mxu0 }
  0x90   :  { %v105_v10 = vadd.f32 %v209_v8, %v104_v9 }
  0x92   :  { %v112_v11 = vmul.f32 %v105_v10, %v105_v10  ;;  %v110_v24 = vmul.f32 0.5, %v105_v10 }
  0x94   :  { %v114_v12 = vmul.f32 %v112_v11, %v105_v10 }
  0x95   :  { %v107_v13 = vpop.f32.mrf.mxu3 }
  0x96   :  { %v116_v14 = vmul.f32 0.044715, %v114_v12  ;;  %v108_v15 = vadd.f32 %v209_v8, %v107_v13 }
  0x98   :  { %v118_v16 = vadd.f32 %v116_v14, %v105_v10  ;;  %v113_v17 = vmul.f32 %v108_v15, %v108_v15  ;;  %v111_v28 = vmul.f32 0.5, %v108_v15 }
  0x9a   :  { %v120_v18 = vmul.f32 0.7978846, %v118_v16  ;;  %v115_v19 = vmul.f32 %v113_v17, %v108_v15 }
  0x9c   :  { %211 = vtanh.f32 %v120_v18  ;;  %v117_v20 = vmul.f32 0.044715, %v115_v19 }
  0x9e   :  { %v119_v21 = vadd.f32 %v117_v20, %v108_v15 }
  0xa0   :  { %v121_v22 = vmul.f32 0.7978846, %v119_v21 }
  0xa2   :  { %v212_v23 = vpop.eup %211  ;;  %213 = vtanh.f32 %v121_v22 }
  0xa3   :  { %v124_v25 = vadd.f32 1.0, %v212_v23 }
  0xa5   :  { %v126_v26 = vmul.f32 %v124_v25, %v110_v24 }
  0xa7   :  { %129 = vst.msk [vmem:[#allocation2] sm:$0xff] %vm128_vm1, %v126_v26 }
  0xa8   :  { %v214_v27 = vpop.eup %213 }
  0xa9   :  { %v125_v29 = vadd.f32 1.0, %v214_v27 }
  0xab   :  { %v127_v30 = vmul.f32 %v125_v29, %v111_v28 }
  0xad   :  { %130 = vst.msk [vmem:[#allocation2 + $0x8] sm:$0xff] %vm128_vm1, %v127_v30 }
  0xae   :  { %v131_v31 = vld [vmem:[#allocation2] sm:$0xff] }
  0xaf   :  { %195 = vmatmul.msk.f32.vlgmr.msra.gmra.mxu1 %vm128_vm1, %v131_v31 }
  0xb4   :  { %v132_v32 = vld [vmem:[#allocation2 + $0x8] sm:$0xff] }
  0xb5   :  { %196 = vmatmul.msk.f32.vlgmr.msra.gmra.mxu2 %vm128_vm1, %v132_v32 }
 0x12c   :  { %v165_v34 = vpop.f32.mrf.mxu1 }
 0x12d   :  { %v166_v35 = vadd.f32 %v210_v33, %v165_v34 }
 0x12f   :  { %171 = vst.msk [vmem:[#allocation9] sm:$0xff] %vm128_vm1, %v166_v35 }
 0x138   :  { %v168_v36 = vpop.f32.mrf.mxu2 }
 0x139   :  { %v169_v37 = vadd.f32 %v210_v33, %v168_v36 }
 0x13b   :  { %172 = vst.msk [vmem:[#allocation9 + $0x8] sm:$0xff] %vm128_vm1, %v169_v37 }
 0x13c   :  { %185 = dma.vmem_to_hbm [thread:$0]  %s178_s11, 256, %s180_s14, [#allocation5], %s318_s26, %s318_s26, %s319_s27  }
 0x13d   :  { %315 = dma.done.wait [#allocation5], 256  }
 0x13e   :  { %316 = vsyncadd [#allocation5], 4294967040 }
 0x13f   :  { %190 = vsyncpa [#allocation4], 1 }
 0x140   :  { %191 = vsyncpa [#allocation7], 1 }
 0x141   :  { %192 = vsyncpa [#allocation5], 1 }

</bundles_post_ra>
